<compile_context>
chip_gen: v5e
topology: v5e:2x2
jax: 0.10.0
libtpu: 0.0.40
codegen_flags: <defaults>
</compile_context>

<pallas_src>
import numpy as np
import jax
import jax.numpy as jnp
from jax import lax
from jax.experimental import pallas as pl
from jax.experimental.pallas import tpu as pltpu


# ----------------------------------------------------------------------------- helpers
def _round_up(x: int, m: int) -> int:
    return ((x + m - 1) // m) * m


def _interp_matrix_np(out_size: int, in_size: int) -> np.ndarray:
    """1-D bilinear interpolation matrix, PyTorch align_corners=True semantics."""
    a = np.zeros((out_size, in_size), np.float64)
    if out_size == 1 or in_size == 1:
        a[:, 0] = 1.0                      # degenerate: everything maps to source index 0
        return a
    scale = (in_size - 1) / (out_size - 1)
    src = np.arange(out_size, dtype=np.float64) * scale
    i0 = np.clip(np.floor(src), 0, in_size - 1).astype(np.int64)
    i1 = np.minimum(i0 + 1, in_size - 1)
    w1 = src - i0
    w0 = 1.0 - w1
    rows = np.arange(out_size)
    a[rows, i0] += w0
    a[rows, i1] += w1                      # i0 == i1 at the end -> weight sums to 1.0
    return a


def _tpu_budget():
    """Generation-aware VMEM budget (bytes) for block sizing, compiler vmem limit,
    and the minimum number of grid steps (for multi-TensorCore sharding)."""
    try:
        cap = int(pltpu.get_tpu_info().vmem_capacity_bytes)
        if cap <= 0:
            cap = 64 * 1024 * 1024
    except Exception:
        cap = 64 * 1024 * 1024             # conservative fallback (v7x-sized)
    budget = min(cap // 2, 64 * 1024 * 1024)            # ~64 MiB v5e/v6e, ~32 MiB v7x
    vmem_limit = min((cap * 3) // 4, budget + 16 * 1024 * 1024)
    try:
        cores = getattr(jax.devices()[0], "num_cores", None)
        cores = int(cores) if cores else 2               # unknown -> assume 2 (cheap on 1-TC chips)
    except Exception:
        cores = 2
    min_steps = 2 if cores >= 2 else 1
    return budget, vmem_limit, min_steps


def _choose_batch(n_imgs: int, per_img_bytes: int, budget_bytes: int,
                  min_steps: int, sublane_align: bool) -> int:
    """How many (n, c) images to process per grid step."""
    bc = max(1, int(budget_bytes) // max(1, int(per_img_bytes)))
    bc = min(bc, max(1, pl.cdiv(n_imgs, min_steps)))
    if bc >= n_imgs:
        return n_imgs                       # single full block: always layout-legal
    if sublane_align:
        # 2-D blocks: the batch axis is the sublane dim -> multiple of 8 (or full dim).
        bc = max(8, (bc // 8) * 8)
        if bc >= n_imgs:
            return n_imgs
    # Prefer a divisor of n_imgs (no ragged last block -> no masking, no padding),
    # as long as it doesn't shrink the tile by more than 2x.
    step = 8 if sublane_align else 1
    d = (bc // step) * step
    while d >= step:
        if n_imgs % d == 0:
            if 2 * d >= bc:
                return d
            break
        d -= step
    return bc                               # ragged last block handled by Pallas masking


# ----------------------------------------------------------------------------- kernels
def _up_kernel_kron(k_ref, x_ref, o_ref):
    # k_ref: (H*W, 4*H*W) fused interpolation matrix (resident, constant index_map)
    # x_ref: (BC, H*W)    o_ref: (BC, 4*H*W)
    o_ref[...] = jnp.dot(
        x_ref[...], k_ref[...], preferred_element_type=jnp.float32
    ).astype(o_ref.dtype)


def _up_kernel_separable(awt_ref, ah_ref, x_ref, o_ref):
    # awt_ref: (W, 2W) pre-transposed A_w ; ah_ref: (2H, H) ; x_ref: (BC, H, W)
    bc, h, w = x_ref.shape
    w_out = awt_ref.shape[1]
    h_out = ah_ref.shape[0]
    # Stage 1: W interpolation as one flat matmul over the whole batch.
    x2d = x_ref[...].reshape(bc * h, w)
    t = jnp.dot(x2d, awt_ref[...], preferred_element_type=jnp.float32)
    t = t.reshape(bc, h, w_out)
    # Stage 2: H interpolation; A_h broadcast happens in VMEM only, once per grid step.
    ah_b = jnp.broadcast_to(ah_ref[...], (bc, h_out, h))
    out = lax.dot_general(
        ah_b, t,
        dimension_numbers=(((2,), (1,)), ((0,), (0,))),
        preferred_element_type=jnp.float32,
    )
    o_ref[...] = out.astype(o_ref.dtype)


# ----------------------------------------------------------------------------- wrapper
@jax.jit
def up_bilinear_2x(x: jnp.ndarray) -> jnp.ndarray:
    """Equivalent of nn.Upsample(scale_factor=2, mode='bilinear', align_corners=True).

    x: (N, C, H, W) float32  ->  (N, C, 2H, 2W) float32
    """
    n, c, h, w = x.shape
    h_out, w_out = 2 * h, 2 * w
    dtype = x.dtype
    itemsize = jnp.dtype(dtype).itemsize
    n_imgs = n * c

    budget, vmem_limit, min_steps = _tpu_budget()

    ah = _interp_matrix_np(h_out, h)        # (2H, H)  host-side constants
    aw = _interp_matrix_np(w_out, w)        # (2W, W)
    hw, hw_out = h * w, h_out * w_out

    # Fast (lane-dense) path whenever the fused Kronecker matrix fits comfortably in
    # VMEM (<= 4 MiB  <=>  H*W <= 512 for f32), which also keeps arithmetic intensity
    # low enough that the kernel stays HBM-bound on all generations.
    use_kron = hw * hw_out * itemsize <= 4 * 1024 * 1024

    if use_kron:
        kmat = jnp.asarray(np.kron(ah, aw).T, dtype=dtype)      # (H*W, 4*H*W)
        x_flat = x.reshape(n_imgs, hw)

        hw_p = _round_up(hw, 128)
        hwo_p = _round_up(hw_out, 128)
        k_vmem = 2 * _round_up(hw, 8) * hwo_p * itemsize        # resident K, double-buffered
        per_img = itemsize * (2 * hw_p + 3 * hwo_p)             # x(x2) + out(x2) + f32 result
        bc = _choose_batch(n_imgs, per_img, max(1, budget - k_vmem),
                           min_steps, sublane_align=True)
        grid = (pl.cdiv(n_imgs, bc),)

        out_flat = pl.pallas_call(
            _up_kernel_kron,
            out_shape=jax.ShapeDtypeStruct((n_imgs, hw_out), dtype),
            grid_spec=pltpu.PrefetchScalarGridSpec(
                num_scalar_prefetch=0,
                grid=grid,
                in_specs=[
                    pl.BlockSpec((hw, hw_out), lambda i: (0, 0)),   # K (resident)
                    pl.BlockSpec((bc, hw), lambda i: (i, 0)),       # BC images
                ],
                out_specs=pl.BlockSpec((bc, hw_out), lambda i: (i, 0)),
            ),
            compiler_params=pltpu.CompilerParams(
                dimension_semantics=("parallel",),
                vmem_limit_bytes=vmem_limit,
            ),
        )(kmat, x_flat)
        return out_flat.reshape(n, c, h_out, w_out)

    # ---- separable fallback for large spatial sizes (not exercised by the test) ----
    awt = jnp.asarray(aw.T, dtype=dtype)    # (W, 2W), pre-transposed
    ahm = jnp.asarray(ah, dtype=dtype)      # (2H, H)
    x3 = x.reshape(n_imgs, h, w)

    w_p, wo_p = _round_up(w, 128), _round_up(w_out, 128)
    h_p8, ho_p8 = _round_up(h, 8), _round_up(h_out, 8)
    weights_vmem = 2 * itemsize * (h_p8 * wo_p + ho_p8 * _round_up(h, 128))
    per_img = itemsize * (
        2 * h_p8 * w_p          # input block, double-buffered
        + 2 * ho_p8 * wo_p      # output block, double-buffered
        + h_p8 * wo_p           # stage-1 intermediate
        + ho_p8 * wo_p          # stage-2 f32 result before cast
        + ho_p8 * _round_up(h, 128)   # in-kernel A_h broadcast
    )
    bc = _choose_batch(n_imgs, per_img, max(1, budget - weights_vmem),
                       min_steps, sublane_align=False)
    grid = (pl.cdiv(n_imgs, bc),)

    out3 = pl.pallas_call(
        _up_kernel_separable,
        out_shape=jax.ShapeDtypeStruct((n_imgs, h_out, w_out), dtype),
        grid_spec=pltpu.PrefetchScalarGridSpec(
            num_scalar_prefetch=0,
            grid=grid,
            in_specs=[
                pl.BlockSpec((w, w_out), lambda i: (0, 0)),       # A_w^T (resident)
                pl.BlockSpec((h_out, h), lambda i: (0, 0)),       # A_h   (resident)
                pl.BlockSpec((bc, h, w), lambda i: (i, 0, 0)),    # BC images
            ],
            out_specs=pl.BlockSpec((bc, h_out, w_out), lambda i: (i, 0, 0)),
        ),
        compiler_params=pltpu.CompilerParams(
            dimension_semantics=("parallel",),
            vmem_limit_bytes=vmem_limit,
        ),
    )(awt, ahm, x3)
    return out3.reshape(n, c, h_out, w_out)


# ----------------------------------------------------------------------------- reference
def _reference(x: jnp.ndarray) -> jnp.ndarray:
    """Plain-JAX reference of the same math (torch bilinear, align_corners=True)."""
    n, c, h, w = x.shape
    ah = jnp.asarray(_interp_matrix_np(2 * h, h), dtype=x.dtype)
    aw = jnp.asarray(_interp_matrix_np(2 * w, w), dtype=x.dtype)
    return jnp.einsum("oh,nchw,pw->ncop", ah, x, aw,
                      precision=lax.Precision.HIGHEST)


if __name__ == "__main__":
    key = jax.random.PRNGKey(0)
    # Small shapes consistent with the module: batch=2, channels=4, spatial=16.
    x = jax.random.normal(key, (2, 4, 16, 16), dtype=jnp.float32)

    out = jax.block_until_ready(up_bilinear_2x(x))

    ref = _reference(x)
    assert out.shape == (2, 4, 32, 32), out.shape
    err = float(jnp.max(jnp.abs(out - ref)))
    assert err < 1e-4, err

    print("KERNEL_OK")
</pallas_src>

<mosaic_0001>
module attributes {stable_mosaic.version = 11 : i64} {
  func.func @_up_kernel_kron(%arg0: i32, %arg1: memref<256x1024xf32, #tpu.memory_space<vmem>>, %arg2: memref<8x256xf32, #tpu.memory_space<vmem>>, %arg3: memref<8x1024xf32, #tpu.memory_space<vmem>>) attributes {dimension_semantics = [#tpu.dimension_semantics<parallel>], iteration_bounds = array<i64: 1>, scalar_prefetch = 0 : i64, scratch_operands = 0 : i64, tpu.core_type = #tpu.core_type<tc>, window_params = [{pipeline_mode = #tpu.pipeline_mode<synchronous>, transform_indices = @transform_0, window_bounds = array<i64: 256, 1024>}, {transform_indices = @transform_1, window_bounds = array<i64: 8, 256>}, {transform_indices = @transform_2, window_bounds = array<i64: 8, 1024>}]} {
    %c0 = arith.constant 0 : index
    %c0_0 = arith.constant 0 : index
    %0 = vector.load %arg2[%c0, %c0_0] : memref<8x256xf32, #tpu.memory_space<vmem>>, vector<8x256xf32>
    %c0_1 = arith.constant 0 : index
    %c0_2 = arith.constant 0 : index
    %1 = vector.load %arg1[%c0_1, %c0_2] : memref<256x1024xf32, #tpu.memory_space<vmem>>, vector<256x1024xf32>
    %cst = arith.constant dense<0.000000e+00> : vector<8x1024xf32>
    %2 = tpu.matmul %0, %1, %cst {dimension_numbers = #tpu.dot_dimension_numbers<[1], [0], [0], [1], [0, 0, 1, 1], [], []>} : vector<8x256xf32>, vector<256x1024xf32>, vector<8x1024xf32> -> vector<8x1024xf32>
    %c0_3 = arith.constant 0 : index
    %c0_4 = arith.constant 0 : index
    %3 = vector.load %arg3[%c0_3, %c0_4] : memref<8x1024xf32, #tpu.memory_space<vmem>>, vector<8x1024xf32>
    tpu.vector_store %arg3[%c0_3, %c0_4], %2 {strides = array<i32>} : memref<8x1024xf32, #tpu.memory_space<vmem>>, vector<8x1024xf32>,
    return
  }
  func.func @transform_0(%arg0: i32) -> (i32, i32) {
    %c0_i32 = arith.constant 0 : i32
    %c0_i32_0 = arith.constant 0 : i32
    %c0_i32_1 = arith.constant 0 : i32
    return %c0_i32, %c0_i32_0 : i32, i32
  }
  func.func @transform_1(%arg0: i32) -> (i32, i32) {
    %c0_i32 = arith.constant 0 : i32
    %c0_i32_0 = arith.constant 0 : i32
    return %arg0, %c0_i32 : i32, i32
  }
  func.func @transform_2(%arg0: i32) -> (i32, i32) {
    %c0_i32 = arith.constant 0 : i32
    %c0_i32_0 = arith.constant 0 : i32
    return %arg0, %c0_i32 : i32, i32
  }
}

</mosaic_0001>

<bundles_post_ra>
// kernel: up_bilinear_2x.1
= control target key start
LH: loop header
LB: loop body
LE: loop exit
PB: predicated region body
PF: predicated region fallthrough
CT: control target
= control target key end

     0   :  { %7 = vsyncpa [#allocation3], 0  ;;  %s647_s12 = smov [#allocation2]   ;;  %s648_s14 = smov 1024   ;;  %s718_s0 = inlined_call_operand.hbm [shape: f32[256,1024], index: 0, kind: input, shape index: {}]   ;;  %s719_s1 = inlined_call_operand.vmem [shape: f32[8,256], index: 1, kind: input, shape index: {}]   ;;  %s720_s2 = inlined_call_operand.vmem [shape: f32[8,1024], index: 2, kind: output, shape index: {}]  }
   0x1   :  { %s12_s11 = sshll.u32 %s718_s0, 4  ;;  %s14_s13 = sshll.u32 %s647_s12, 4  ;;  %s13_s11 = int_to_ptr.hbm [resolvable:$true] %s12_s11  ;;  %s15_s13 = int_to_ptr.vmem [resolvable:$true] %s14_s13 }
   0x2   :  { %s649_s15 = smov 64  }
   0x3   :  { %20 = dma.hbm_to_vmem [thread:$0]  %s13_s11, 32768, %s15_s13, [#allocation3], %s648_s14, %s648_s14, %s649_s15  }
   0x4   :  { %645 = dma.done.wait [#allocation3], 32768  }
   0x5   :  { %646 = vsyncadd [#allocation3], 4294934528  ;;  %v150_v0 = vld [vmem:[#allocation2 + $0x3c8] sm:$0xff]  ;;  %v149_v6 = vld [vmem:[#allocation2 + $0x3c0] sm:$0xff] }
   0x6   :  { %v278_v1 = vld [vmem:[#allocation2 + $0x7c8] sm:$0xff]  ;;  %325 = vmatpush.msra.mxu2 %v150_v0  ;;  %v277_v7 = vld [vmem:[#allocation2 + $0x7c0] sm:$0xff]  ;;  %285 = vmatpush.msra.mxu0 %v149_v6  ;;  %v152_v60 = vld [vmem:[#allocation2 + $0x3d8] sm:$0xff] }
   0x7   :  { %v142_v2 = vld [vmem:[#allocation2 + $0x388] sm:$0xff]  ;;  %345 = vmatpush.msra.mxu3 %v278_v1  ;;  %v141_v8 = vld [vmem:[#allocation2 + $0x380] sm:$0xff]  ;;  %305 = vmatpush.msra.mxu1 %v277_v7  ;;  %v280_v61 = vld [vmem:[#allocation2 + $0x7d8] sm:$0xff] }
   0x8   :  { %v270_v3 = vld [vmem:[#allocation2 + $0x788] sm:$0xff]  ;;  %326 = vmatpush.msra.mxu2 %v142_v2  ;;  %v269_v9 = vld [vmem:[#allocation2 + $0x780] sm:$0xff]  ;;  %286 = vmatpush.msra.mxu0 %v141_v8  ;;  %v144_v0 = vld [vmem:[#allocation2 + $0x398] sm:$0xff] }
   0x9   :  { %v134_v4 = vld [vmem:[#allocation2 + $0x348] sm:$0xff]  ;;  %346 = vmatpush.msra.mxu3 %v270_v3  ;;  %v133_v12 = vld [vmem:[#allocation2 + $0x340] sm:$0xff]  ;;  %306 = vmatpush.msra.mxu1 %v269_v9  ;;  %v272_v1 = vld [vmem:[#allocation2 + $0x798] sm:$0xff] }
   0xa   :  { %v262_v5 = vld [vmem:[#allocation2 + $0x748] sm:$0xff]  ;;  %327 = vmatpush.msra.mxu2 %v134_v4  ;;  %v261_v13 = vld [vmem:[#allocation2 + $0x740] sm:$0xff]  ;;  %287 = vmatpush.msra.mxu0 %v133_v12  ;;  %v136_v4 = vld [vmem:[#allocation2 + $0x358] sm:$0xff] }
   0xb   :  { %v126_v10 = vld [vmem:[#allocation2 + $0x308] sm:$0xff]  ;;  %347 = vmatpush.msra.mxu3 %v262_v5  ;;  %v125_v16 = vld [vmem:[#allocation2 + $0x300] sm:$0xff]  ;;  %307 = vmatpush.msra.mxu1 %v261_v13  ;;  %v264_v5 = vld [vmem:[#allocation2 + $0x758] sm:$0xff] }
   0xc   :  { %v254_v11 = vld [vmem:[#allocation2 + $0x708] sm:$0xff]  ;;  %328 = vmatpush.msra.mxu2 %v126_v10  ;;  %v253_v17 = vld [vmem:[#allocation2 + $0x700] sm:$0xff]  ;;  %288 = vmatpush.msra.mxu0 %v125_v16  ;;  %v151_v6 = vld [vmem:[#allocation2 + $0x3d0] sm:$0xff] }
   0xd   :  { %v118_v14 = vld [vmem:[#allocation2 + $0x2c8] sm:$0xff]  ;;  %348 = vmatpush.msra.mxu3 %v254_v11  ;;  %v117_v20 = vld [vmem:[#allocation2 + $0x2c0] sm:$0xff]  ;;  %308 = vmatpush.msra.mxu1 %v253_v17  ;;  %v279_v7 = vld [vmem:[#allocation2 + $0x7d0] sm:$0xff] }
   0xe   :  { %v246_v15 = vld [vmem:[#allocation2 + $0x6c8] sm:$0xff]  ;;  %329 = vmatpush.msra.mxu2 %v118_v14  ;;  %v245_v21 = vld [vmem:[#allocation2 + $0x6c0] sm:$0xff]  ;;  %289 = vmatpush.msra.mxu0 %v117_v20  ;;  %v128_v8 = vld [vmem:[#allocation2 + $0x318] sm:$0xff] }
   0xf   :  { %v110_v18 = vld [vmem:[#allocation2 + $0x288] sm:$0xff]  ;;  %349 = vmatpush.msra.mxu3 %v246_v15  ;;  %v109_v24 = vld [vmem:[#allocation2 + $0x280] sm:$0xff]  ;;  %309 = vmatpush.msra.mxu1 %v245_v21  ;;  %v256_v9 = vld [vmem:[#allocation2 + $0x718] sm:$0xff] }
  0x10   :  { %v238_v19 = vld [vmem:[#allocation2 + $0x688] sm:$0xff]  ;;  %330 = vmatpush.msra.mxu2 %v110_v18  ;;  %v237_v25 = vld [vmem:[#allocation2 + $0x680] sm:$0xff]  ;;  %290 = vmatpush.msra.mxu0 %v109_v24  ;;  %v143_v10 = vld [vmem:[#allocation2 + $0x390] sm:$0xff] }
  0x11   :  { %v102_v22 = vld [vmem:[#allocation2 + $0x248] sm:$0xff]  ;;  %350 = vmatpush.msra.mxu3 %v238_v19  ;;  %v101_v28 = vld [vmem:[#allocation2 + $0x240] sm:$0xff]  ;;  %310 = vmatpush.msra.mxu1 %v237_v25  ;;  %v271_v11 = vld [vmem:[#allocation2 + $0x790] sm:$0xff] }
  0x12   :  { %v230_v23 = vld [vmem:[#allocation2 + $0x648] sm:$0xff]  ;;  %331 = vmatpush.msra.mxu2 %v102_v22  ;;  %v229_v29 = vld [vmem:[#allocation2 + $0x640] sm:$0xff]  ;;  %291 = vmatpush.msra.mxu0 %v101_v28  ;;  %v120_v12 = vld [vmem:[#allocation2 + $0x2d8] sm:$0xff] }
  0x13   :  { %v94_v26 = vld [vmem:[#allocation2 + $0x208] sm:$0xff]  ;;  %351 = vmatpush.msra.mxu3 %v230_v23  ;;  %v93_v32 = vld [vmem:[#allocation2 + $0x200] sm:$0xff]  ;;  %311 = vmatpush.msra.mxu1 %v229_v29  ;;  %v248_v13 = vld [vmem:[#allocation2 + $0x6d8] sm:$0xff] }
  0x14   :  { %v222_v27 = vld [vmem:[#allocation2 + $0x608] sm:$0xff]  ;;  %332 = vmatpush.msra.mxu2 %v94_v26  ;;  %v221_v33 = vld [vmem:[#allocation2 + $0x600] sm:$0xff]  ;;  %292 = vmatpush.msra.mxu0 %v93_v32  ;;  %v135_v14 = vld [vmem:[#allocation2 + $0x350] sm:$0xff] }
  0x15   :  { %v86_v30 = vld [vmem:[#allocation2 + $0x1c8] sm:$0xff]  ;;  %352 = vmatpush.msra.mxu3 %v222_v27  ;;  %v85_v36 = vld [vmem:[#allocation2 + $0x1c0] sm:$0xff]  ;;  %312 = vmatpush.msra.mxu1 %v221_v33  ;;  %v263_v15 = vld [vmem:[#allocation2 + $0x750] sm:$0xff] }
  0x16   :  { %v214_v31 = vld [vmem:[#allocation2 + $0x5c8] sm:$0xff]  ;;  %333 = vmatpush.msra.mxu2 %v86_v30  ;;  %v213_v37 = vld [vmem:[#allocation2 + $0x5c0] sm:$0xff]  ;;  %293 = vmatpush.msra.mxu0 %v85_v36  ;;  %v112_v16 = vld [vmem:[#allocation2 + $0x298] sm:$0xff] }
  0x17   :  { %v78_v34 = vld [vmem:[#allocation2 + $0x188] sm:$0xff]  ;;  %353 = vmatpush.msra.mxu3 %v214_v31  ;;  %v77_v40 = vld [vmem:[#allocation2 + $0x180] sm:$0xff]  ;;  %313 = vmatpush.msra.mxu1 %v213_v37  ;;  %v240_v17 = vld [vmem:[#allocation2 + $0x698] sm:$0xff] }
  0x18   :  { %v206_v35 = vld [vmem:[#allocation2 + $0x588] sm:$0xff]  ;;  %334 = vmatpush.msra.mxu2 %v78_v34  ;;  %v205_v41 = vld [vmem:[#allocation2 + $0x580] sm:$0xff]  ;;  %294 = vmatpush.msra.mxu0 %v77_v40  ;;  %v127_v18 = vld [vmem:[#allocation2 + $0x310] sm:$0xff] }
  0x19   :  { %v70_v38 = vld [vmem:[#allocation2 + $0x148] sm:$0xff]  ;;  %354 = vmatpush.msra.mxu3 %v206_v35  ;;  %v69_v44 = vld [vmem:[#allocation2 + $0x140] sm:$0xff]  ;;  %314 = vmatpush.msra.mxu1 %v205_v41  ;;  %v255_v19 = vld [vmem:[#allocation2 + $0x710] sm:$0xff] }
  0x1a   :  { %v198_v39 = vld [vmem:[#allocation2 + $0x548] sm:$0xff]  ;;  %335 = vmatpush.msra.mxu2 %v70_v38  ;;  %v197_v45 = vld [vmem:[#allocation2 + $0x540] sm:$0xff]  ;;  %295 = vmatpush.msra.mxu0 %v69_v44  ;;  %v104_v20 = vld [vmem:[#allocation2 + $0x258] sm:$0xff] }
  0x1b   :  { %v62_v42 = vld [vmem:[#allocation2 + $0x108] sm:$0xff]  ;;  %355 = vmatpush.msra.mxu3 %v198_v39  ;;  %v61_v48 = vld [vmem:[#allocation2 + $0x100] sm:$0xff]  ;;  %315 = vmatpush.msra.mxu1 %v197_v45  ;;  %v232_v21 = vld [vmem:[#allocation2 + $0x658] sm:$0xff] }
  0x1c   :  { %v190_v43 = vld [vmem:[#allocation2 + $0x508] sm:$0xff]  ;;  %336 = vmatpush.msra.mxu2 %v62_v42  ;;  %v189_v49 = vld [vmem:[#allocation2 + $0x500] sm:$0xff]  ;;  %296 = vmatpush.msra.mxu0 %v61_v48  ;;  %v119_v22 = vld [vmem:[#allocation2 + $0x2d0] sm:$0xff] }
  0x1d   :  { %v54_v46 = vld [vmem:[#allocation2 + $0xc8] sm:$0xff]  ;;  %356 = vmatpush.msra.mxu3 %v190_v43  ;;  %v53_v52 = vld [vmem:[#allocation2 + $0xc0] sm:$0xff]  ;;  %316 = vmatpush.msra.mxu1 %v189_v49  ;;  %v247_v23 = vld [vmem:[#allocation2 + $0x6d0] sm:$0xff] }
  0x1e   :  { %v182_v47 = vld [vmem:[#allocation2 + $0x4c8] sm:$0xff]  ;;  %337 = vmatpush.msra.mxu2 %v54_v46  ;;  %v181_v53 = vld [vmem:[#allocation2 + $0x4c0] sm:$0xff]  ;;  %297 = vmatpush.msra.mxu0 %v53_v52  ;;  %v96_v24 = vld [vmem:[#allocation2 + $0x218] sm:$0xff] }
  0x1f   :  { %v46_v50 = vld [vmem:[#allocation2 + $0x88] sm:$0xff]  ;;  %357 = vmatpush.msra.mxu3 %v182_v47  ;;  %v45_v56 = vld [vmem:[#allocation2 + $0x80] sm:$0xff]  ;;  %317 = vmatpush.msra.mxu1 %v181_v53  ;;  %v224_v25 = vld [vmem:[#allocation2 + $0x618] sm:$0xff] }
  0x20   :  { %v174_v51 = vld [vmem:[#allocation2 + $0x488] sm:$0xff]  ;;  %338 = vmatpush.msra.mxu2 %v46_v50  ;;  %v173_v57 = vld [vmem:[#allocation2 + $0x480] sm:$0xff]  ;;  %298 = vmatpush.msra.mxu0 %v45_v56  ;;  %v111_v26 = vld [vmem:[#allocation2 + $0x290] sm:$0xff] }
  0x21   :  { %v38_v54 = vld [vmem:[#allocation2 + $0x48] sm:$0xff]  ;;  %358 = vmatpush.msra.mxu3 %v174_v51  ;;  %318 = vmatpush.msra.mxu1 %v173_v57  ;;  %v37_v62 = vld [vmem:[#allocation2 + $0x40] sm:$0xff]  ;;  %v239_v27 = vld [vmem:[#allocation2 + $0x690] sm:$0xff] }
  0x22   :  { %v166_v55 = vld [vmem:[#allocation2 + $0x448] sm:$0xff]  ;;  %339 = vmatpush.msra.mxu2 %v38_v54  ;;  %v165_v63 = vld [vmem:[#allocation2 + $0x440] sm:$0xff]  ;;  %299 = vmatpush.msra.mxu0 %v37_v62  ;;  %v88_v28 = vld [vmem:[#allocation2 + $0x1d8] sm:$0xff] }
  0x23   :  { %v30_v58 = vld [vmem:[#allocation2 + $0x8] sm:$0xff]  ;;  %359 = vmatpush.msra.mxu3 %v166_v55  ;;  %v29_v2 = vld [vmem:[#allocation2] sm:$0xff]  ;;  %319 = vmatpush.msra.mxu1 %v165_v63  ;;  %v216_v29 = vld [vmem:[#allocation2 + $0x5d8] sm:$0xff] }
  0x24   :  { %v158_v59 = vld [vmem:[#allocation2 + $0x408] sm:$0xff]  ;;  %340 = vmatpush.msra.mxu2 %v30_v58  ;;  %v157_v3 = vld [vmem:[#allocation2 + $0x400] sm:$0xff]  ;;  %300 = vmatpush.msra.mxu0 %v29_v2  ;;  %v103_v30 = vld [vmem:[#allocation2 + $0x250] sm:$0xff] }
  0x25   :  { %360 = vmatpush.msra.mxu3 %v158_v59  ;;  %320 = vmatpush.msra.mxu1 %v157_v3  ;;  %v231_v31 = vld [vmem:[#allocation2 + $0x650] sm:$0xff]  ;;  %v80_v32 = vld [vmem:[#allocation2 + $0x198] sm:$0xff]  ;;  %v671_v58 = vld [vmem:[%s719_s1] sm:$0xff] }
  0x26   :  { %405 = vmatpush.msrb.mxu2 %v152_v60  ;;  %365 = vmatpush.msrb.mxu0 %v151_v6  ;;  %v208_v33 = vld [vmem:[#allocation2 + $0x598] sm:$0xff]  ;;  %v95_v34 = vld [vmem:[#allocation2 + $0x210] sm:$0xff]  ;;  %v676_v59 = vld [vmem:[%s719_s1 + $0x8] sm:$0xff] }
  0x27   :  { %425 = vmatpush.msrb.mxu3 %v280_v61  ;;  %385 = vmatpush.msrb.mxu1 %v279_v7  ;;  %v223_v35 = vld [vmem:[#allocation2 + $0x610] sm:$0xff]  ;;  %v72_v36 = vld [vmem:[#allocation2 + $0x158] sm:$0xff]  ;;  %v154_v60 = vld [vmem:[#allocation2 + $0x3e8] sm:$0xff] }
  0x28   :  { %406 = vmatpush.msrb.mxu2 %v144_v0  ;;  %366 = vmatpush.msrb.mxu0 %v143_v10  ;;  %v200_v37 = vld [vmem:[#allocation2 + $0x558] sm:$0xff]  ;;  %v87_v38 = vld [vmem:[#allocation2 + $0x1d0] sm:$0xff]  ;;  %v282_v61 = vld [vmem:[#allocation2 + $0x7e8] sm:$0xff] }
  0x29   :  { %426 = vmatpush.msrb.mxu3 %v272_v1  ;;  %386 = vmatpush.msrb.mxu1 %v271_v11  ;;  %v215_v39 = vld [vmem:[#allocation2 + $0x5d0] sm:$0xff]  ;;  %v64_v40 = vld [vmem:[#allocation2 + $0x118] sm:$0xff]  ;;  %v146_v0 = vld [vmem:[#allocation2 + $0x3a8] sm:$0xff] }
  0x2a   :  { %407 = vmatpush.msrb.mxu2 %v136_v4  ;;  %367 = vmatpush.msrb.mxu0 %v135_v14  ;;  %v192_v41 = vld [vmem:[#allocation2 + $0x518] sm:$0xff]  ;;  %v79_v42 = vld [vmem:[#allocation2 + $0x190] sm:$0xff]  ;;  %v274_v1 = vld [vmem:[#allocation2 + $0x7a8] sm:$0xff] }
  0x2b   :  { %427 = vmatpush.msrb.mxu3 %v264_v5  ;;  %387 = vmatpush.msrb.mxu1 %v263_v15  ;;  %v207_v43 = vld [vmem:[#allocation2 + $0x590] sm:$0xff]  ;;  %v56_v44 = vld [vmem:[#allocation2 + $0xd8] sm:$0xff]  ;;  %v138_v4 = vld [vmem:[#allocation2 + $0x368] sm:$0xff] }
  0x2c   :  { %408 = vmatpush.msrb.mxu2 %v128_v8  ;;  %368 = vmatpush.msrb.mxu0 %v127_v18  ;;  %v184_v45 = vld [vmem:[#allocation2 + $0x4d8] sm:$0xff]  ;;  %v71_v46 = vld [vmem:[#allocation2 + $0x150] sm:$0xff]  ;;  %v266_v5 = vld [vmem:[#allocation2 + $0x768] sm:$0xff] }
  0x2d   :  { %428 = vmatpush.msrb.mxu3 %v256_v9  ;;  %388 = vmatpush.msrb.mxu1 %v255_v19  ;;  %v199_v47 = vld [vmem:[#allocation2 + $0x550] sm:$0xff]  ;;  %v48_v48 = vld [vmem:[#allocation2 + $0x98] sm:$0xff]  ;;  %v153_v8 = vld [vmem:[#allocation2 + $0x3e0] sm:$0xff] }
  0x2e   :  { %409 = vmatpush.msrb.mxu2 %v120_v12  ;;  %369 = vmatpush.msrb.mxu0 %v119_v22  ;;  %v176_v49 = vld [vmem:[#allocation2 + $0x498] sm:$0xff]  ;;  %v63_v50 = vld [vmem:[#allocation2 + $0x110] sm:$0xff]  ;;  %v281_v9 = vld [vmem:[#allocation2 + $0x7e0] sm:$0xff] }
  0x2f   :  { %429 = vmatpush.msrb.mxu3 %v248_v13  ;;  %389 = vmatpush.msrb.mxu1 %v247_v23  ;;  %v191_v51 = vld [vmem:[#allocation2 + $0x510] sm:$0xff]  ;;  %v40_v52 = vld [vmem:[#allocation2 + $0x58] sm:$0xff]  ;;  %v130_v10 = vld [vmem:[#allocation2 + $0x328] sm:$0xff] }
  0x30   :  { %410 = vmatpush.msrb.mxu2 %v112_v16  ;;  %370 = vmatpush.msrb.mxu0 %v111_v26  ;;  %v168_v53 = vld [vmem:[#allocation2 + $0x458] sm:$0xff]  ;;  %v55_v54 = vld [vmem:[#allocation2 + $0xd0] sm:$0xff]  ;;  %v258_v11 = vld [vmem:[#allocation2 + $0x728] sm:$0xff] }
  0x31   :  { %430 = vmatpush.msrb.mxu3 %v240_v17  ;;  %390 = vmatpush.msrb.mxu1 %v239_v27  ;;  %v183_v55 = vld [vmem:[#allocation2 + $0x4d0] sm:$0xff]  ;;  %v32_v56 = vld [vmem:[#allocation2 + $0x18] sm:$0xff]  ;;  %v145_v12 = vld [vmem:[#allocation2 + $0x3a0] sm:$0xff] }
  0x32   :  { %411 = vmatpush.msrb.mxu2 %v104_v20  ;;  %371 = vmatpush.msrb.mxu0 %v103_v30  ;;  %v160_v57 = vld [vmem:[#allocation2 + $0x418] sm:$0xff]  ;;  %v47_v62 = vld [vmem:[#allocation2 + $0x90] sm:$0xff]  ;;  %v273_v13 = vld [vmem:[#allocation2 + $0x7a0] sm:$0xff] }
  0x33   :  { %431 = vmatpush.msrb.mxu3 %v232_v21  ;;  %391 = vmatpush.msrb.mxu1 %v231_v31  ;;  %v175_v63 = vld [vmem:[#allocation2 + $0x490] sm:$0xff]  ;;  %v122_v14 = vld [vmem:[#allocation2 + $0x2e8] sm:$0xff]  ;;  %v137_v16 = vld [vmem:[#allocation2 + $0x360] sm:$0xff] }
  0x34   :  { %412 = vmatpush.msrb.mxu2 %v96_v24  ;;  %372 = vmatpush.msrb.mxu0 %v95_v34  ;;  %v39_v2 = vld [vmem:[#allocation2 + $0x50] sm:$0xff]  ;;  %v250_v15 = vld [vmem:[#allocation2 + $0x6e8] sm:$0xff]  ;;  %v265_v17 = vld [vmem:[#allocation2 + $0x760] sm:$0xff] }
  0x35   :  { %432 = vmatpush.msrb.mxu3 %v224_v25  ;;  %392 = vmatpush.msrb.mxu1 %v223_v35  ;;  %v167_v3 = vld [vmem:[#allocation2 + $0x450] sm:$0xff]  ;;  %v114_v18 = vld [vmem:[#allocation2 + $0x2a8] sm:$0xff]  ;;  %v129_v20 = vld [vmem:[#allocation2 + $0x320] sm:$0xff] }
  0x36   :  { %413 = vmatpush.msrb.mxu2 %v88_v28  ;;  %373 = vmatpush.msrb.mxu0 %v87_v38  ;;  %v31_v6 = vld [vmem:[#allocation2 + $0x10] sm:$0xff]  ;;  %v242_v19 = vld [vmem:[#allocation2 + $0x6a8] sm:$0xff]  ;;  %v257_v21 = vld [vmem:[#allocation2 + $0x720] sm:$0xff] }
  0x37   :  { %433 = vmatpush.msrb.mxu3 %v216_v29  ;;  %393 = vmatpush.msrb.mxu1 %v215_v39  ;;  %v159_v7 = vld [vmem:[#allocation2 + $0x410] sm:$0xff]  ;;  %v106_v22 = vld [vmem:[#allocation2 + $0x268] sm:$0xff]  ;;  %v121_v24 = vld [vmem:[#allocation2 + $0x2e0] sm:$0xff] }
  0x38   :  { %414 = vmatpush.msrb.mxu2 %v80_v32  ;;  %374 = vmatpush.msrb.mxu0 %v79_v42  ;;  %v234_v23 = vld [vmem:[#allocation2 + $0x668] sm:$0xff]  ;;  %v249_v25 = vld [vmem:[#allocation2 + $0x6e0] sm:$0xff] }
  0x39   :  { %434 = vmatpush.msrb.mxu3 %v208_v33  ;;  %394 = vmatpush.msrb.mxu1 %v207_v43  ;;  %v98_v26 = vld [vmem:[#allocation2 + $0x228] sm:$0xff]  ;;  %v113_v28 = vld [vmem:[#allocation2 + $0x2a0] sm:$0xff] }
  0x3a   :  { %415 = vmatpush.msrb.mxu2 %v72_v36  ;;  %375 = vmatpush.msrb.mxu0 %v71_v46  ;;  %v226_v27 = vld [vmem:[#allocation2 + $0x628] sm:$0xff]  ;;  %v241_v29 = vld [vmem:[#allocation2 + $0x6a0] sm:$0xff] }
  0x3b   :  { %435 = vmatpush.msrb.mxu3 %v200_v37  ;;  %395 = vmatpush.msrb.mxu1 %v199_v47  ;;  %v90_v30 = vld [vmem:[#allocation2 + $0x1e8] sm:$0xff]  ;;  %v105_v32 = vld [vmem:[#allocation2 + $0x260] sm:$0xff] }
  0x3c   :  { %416 = vmatpush.msrb.mxu2 %v64_v40  ;;  %376 = vmatpush.msrb.mxu0 %v63_v50  ;;  %v218_v31 = vld [vmem:[#allocation2 + $0x5e8] sm:$0xff]  ;;  %v233_v33 = vld [vmem:[#allocation2 + $0x660] sm:$0xff] }
  0x3d   :  { %436 = vmatpush.msrb.mxu3 %v192_v41  ;;  %396 = vmatpush.msrb.mxu1 %v191_v51  ;;  %v82_v34 = vld [vmem:[#allocation2 + $0x1a8] sm:$0xff]  ;;  %v97_v36 = vld [vmem:[#allocation2 + $0x220] sm:$0xff] }
  0x3e   :  { %417 = vmatpush.msrb.mxu2 %v56_v44  ;;  %377 = vmatpush.msrb.mxu0 %v55_v54  ;;  %v210_v35 = vld [vmem:[#allocation2 + $0x5a8] sm:$0xff]  ;;  %v225_v37 = vld [vmem:[#allocation2 + $0x620] sm:$0xff] }
  0x3f   :  { %437 = vmatpush.msrb.mxu3 %v184_v45  ;;  %397 = vmatpush.msrb.mxu1 %v183_v55  ;;  %v74_v38 = vld [vmem:[#allocation2 + $0x168] sm:$0xff]  ;;  %v89_v40 = vld [vmem:[#allocation2 + $0x1e0] sm:$0xff] }
  0x40   :  { %418 = vmatpush.msrb.mxu2 %v48_v48  ;;  %361 = vmatmul.f32.vlgmr.msra.gmra.mxu3 %v676_v59  ;;  %v202_v39 = vld [vmem:[#allocation2 + $0x568] sm:$0xff]  ;;  %v217_v41 = vld [vmem:[#allocation2 + $0x5e0] sm:$0xff] }
  0x41   :  { %438 = vmatpush.msrb.mxu3 %v176_v49  ;;  %341 = vmatmul.f32.vlgmr.msra.gmra.mxu2 %v671_v58  ;;  %v66_v42 = vld [vmem:[#allocation2 + $0x128] sm:$0xff]  ;;  %v81_v44 = vld [vmem:[#allocation2 + $0x1a0] sm:$0xff] }
  0x42   :  { %419 = vmatpush.msrb.mxu2 %v40_v52  ;;  %378 = vmatpush.msrb.mxu0 %v47_v62  ;;  %v194_v43 = vld [vmem:[#allocation2 + $0x528] sm:$0xff]  ;;  %v209_v45 = vld [vmem:[#allocation2 + $0x5a0] sm:$0xff]  ;;  %v156_v62 = vld [vmem:[#allocation2 + $0x3f8] sm:$0xff] }
  0x43   :  { %439 = vmatpush.msrb.mxu3 %v168_v53  ;;  %398 = vmatpush.msrb.mxu1 %v175_v63  ;;  %v58_v46 = vld [vmem:[#allocation2 + $0xe8] sm:$0xff]  ;;  %v73_v48 = vld [vmem:[#allocation2 + $0x160] sm:$0xff]  ;;  %v284_v63 = vld [vmem:[#allocation2 + $0x7f8] sm:$0xff] }
  0x44   :  { %420 = vmatpush.msrb.mxu2 %v32_v56  ;;  %379 = vmatpush.msrb.mxu0 %v39_v2  ;;  %v186_v47 = vld [vmem:[#allocation2 + $0x4e8] sm:$0xff]  ;;  %v201_v49 = vld [vmem:[#allocation2 + $0x560] sm:$0xff]  ;;  %v148_v2 = vld [vmem:[#allocation2 + $0x3b8] sm:$0xff] }
  0x45   :  { %440 = vmatpush.msrb.mxu3 %v160_v57  ;;  %399 = vmatpush.msrb.mxu1 %v167_v3  ;;  %v50_v50 = vld [vmem:[#allocation2 + $0xa8] sm:$0xff]  ;;  %v65_v52 = vld [vmem:[#allocation2 + $0x120] sm:$0xff]  ;;  %v276_v3 = vld [vmem:[#allocation2 + $0x7b8] sm:$0xff] }
  0x46   :  { %485 = vmatpush.msra.mxu2 %v154_v60  ;;  %380 = vmatpush.msrb.mxu0 %v31_v6  ;;  %v178_v51 = vld [vmem:[#allocation2 + $0x4a8] sm:$0xff]  ;;  %v193_v53 = vld [vmem:[#allocation2 + $0x520] sm:$0xff]  ;;  %v140_v6 = vld [vmem:[#allocation2 + $0x378] sm:$0xff] }
  0x47   :  { %505 = vmatpush.msra.mxu3 %v282_v61  ;;  %400 = vmatpush.msrb.mxu1 %v159_v7  ;;  %v42_v54 = vld [vmem:[#allocation2 + $0x68] sm:$0xff]  ;;  %v57_v56 = vld [vmem:[#allocation2 + $0xe0] sm:$0xff]  ;;  %v268_v7 = vld [vmem:[#allocation2 + $0x778] sm:$0xff] }
  0x48   :  { %486 = vmatpush.msra.mxu2 %v146_v0  ;;  %301 = vmatmul.f32.vlgmr.msra.gmra.mxu0 %v671_v58  ;;  %v170_v55 = vld [vmem:[#allocation2 + $0x468] sm:$0xff]  ;;  %v185_v57 = vld [vmem:[#allocation2 + $0x4e0] sm:$0xff] }
  0x49   :  { %506 = vmatpush.msra.mxu3 %v274_v1  ;;  %321 = vmatmul.f32.vlgmr.msra.gmra.mxu1 %v676_v59  ;;  %v34_v60 = vld [vmem:[#allocation2 + $0x28] sm:$0xff]  ;;  %v49_v0 = vld [vmem:[#allocation2 + $0xa0] sm:$0xff] }
  0x4a   :  { %487 = vmatpush.msra.mxu2 %v138_v4  ;;  %445 = vmatpush.msra.mxu0 %v153_v8  ;;  %v162_v61 = vld [vmem:[#allocation2 + $0x428] sm:$0xff]  ;;  %v177_v1 = vld [vmem:[#allocation2 + $0x4a0] sm:$0xff] }
  0x4b   :  { %507 = vmatpush.msra.mxu3 %v266_v5  ;;  %465 = vmatpush.msra.mxu1 %v281_v9  ;;  %v41_v4 = vld [vmem:[#allocation2 + $0x60] sm:$0xff] }
  0x4c   :  { %488 = vmatpush.msra.mxu2 %v130_v10  ;;  %446 = vmatpush.msra.mxu0 %v145_v12  ;;  %v169_v5 = vld [vmem:[#allocation2 + $0x460] sm:$0xff]  ;;  %v155_v10 = vld [vmem:[#allocation2 + $0x3f0] sm:$0xff]  ;;  %v132_v12 = vld [vmem:[#allocation2 + $0x338] sm:$0xff] }
  0x4d   :  { %508 = vmatpush.msra.mxu3 %v258_v11  ;;  %466 = vmatpush.msra.mxu1 %v273_v13  ;;  %v33_v8 = vld [vmem:[#allocation2 + $0x20] sm:$0xff]  ;;  %v283_v11 = vld [vmem:[#allocation2 + $0x7f0] sm:$0xff]  ;;  %v260_v13 = vld [vmem:[#allocation2 + $0x738] sm:$0xff] }
  0x4e   :  { %489 = vmatpush.msra.mxu2 %v122_v14  ;;  %447 = vmatpush.msra.mxu0 %v137_v16  ;;  %v161_v9 = vld [vmem:[#allocation2 + $0x420] sm:$0xff]  ;;  %v147_v14 = vld [vmem:[#allocation2 + $0x3b0] sm:$0xff]  ;;  %v124_v16 = vld [vmem:[#allocation2 + $0x2f8] sm:$0xff] }
  0x4f   :  { %509 = vmatpush.msra.mxu3 %v250_v15  ;;  %467 = vmatpush.msra.mxu1 %v265_v17  ;;  %v275_v15 = vld [vmem:[#allocation2 + $0x7b0] sm:$0xff]  ;;  %v252_v17 = vld [vmem:[#allocation2 + $0x6f8] sm:$0xff] }
  0x50   :  { %490 = vmatpush.msra.mxu2 %v114_v18  ;;  %448 = vmatpush.msra.mxu0 %v129_v20  ;;  %v139_v18 = vld [vmem:[#allocation2 + $0x370] sm:$0xff]  ;;  %v116_v20 = vld [vmem:[#allocation2 + $0x2b8] sm:$0xff] }
  0x51   :  { %510 = vmatpush.msra.mxu3 %v242_v19  ;;  %468 = vmatpush.msra.mxu1 %v257_v21  ;;  %v267_v19 = vld [vmem:[#allocation2 + $0x770] sm:$0xff]  ;;  %v244_v21 = vld [vmem:[#allocation2 + $0x6b8] sm:$0xff] }
  0x52   :  { %491 = vmatpush.msra.mxu2 %v106_v22  ;;  %449 = vmatpush.msra.mxu0 %v121_v24  ;;  %v131_v22 = vld [vmem:[#allocation2 + $0x330] sm:$0xff]  ;;  %v108_v24 = vld [vmem:[#allocation2 + $0x278] sm:$0xff] }
  0x53   :  { %511 = vmatpush.msra.mxu3 %v234_v23  ;;  %469 = vmatpush.msra.mxu1 %v249_v25  ;;  %v259_v23 = vld [vmem:[#allocation2 + $0x730] sm:$0xff]  ;;  %v236_v25 = vld [vmem:[#allocation2 + $0x678] sm:$0xff] }
  0x54   :  { %492 = vmatpush.msra.mxu2 %v98_v26  ;;  %450 = vmatpush.msra.mxu0 %v113_v28  ;;  %v123_v26 = vld [vmem:[#allocation2 + $0x2f0] sm:$0xff]  ;;  %v100_v28 = vld [vmem:[#allocation2 + $0x238] sm:$0xff] }
  0x55   :  { %512 = vmatpush.msra.mxu3 %v226_v27  ;;  %470 = vmatpush.msra.mxu1 %v241_v29  ;;  %v251_v27 = vld [vmem:[#allocation2 + $0x6f0] sm:$0xff]  ;;  %v228_v29 = vld [vmem:[#allocation2 + $0x638] sm:$0xff] }
  0x56   :  { %493 = vmatpush.msra.mxu2 %v90_v30  ;;  %451 = vmatpush.msra.mxu0 %v105_v32  ;;  %v115_v30 = vld [vmem:[#allocation2 + $0x2b0] sm:$0xff]  ;;  %v92_v32 = vld [vmem:[#allocation2 + $0x1f8] sm:$0xff] }
  0x57   :  { %513 = vmatpush.msra.mxu3 %v218_v31  ;;  %471 = vmatpush.msra.mxu1 %v233_v33  ;;  %v243_v31 = vld [vmem:[#allocation2 + $0x6b0] sm:$0xff]  ;;  %v220_v33 = vld [vmem:[#allocation2 + $0x5f8] sm:$0xff] }
  0x58   :  { %494 = vmatpush.msra.mxu2 %v82_v34  ;;  %452 = vmatpush.msra.mxu0 %v97_v36  ;;  %v107_v34 = vld [vmem:[#allocation2 + $0x270] sm:$0xff]  ;;  %v84_v36 = vld [vmem:[#allocation2 + $0x1b8] sm:$0xff] }
  0x59   :  { %514 = vmatpush.msra.mxu3 %v210_v35  ;;  %472 = vmatpush.msra.mxu1 %v225_v37  ;;  %v235_v35 = vld [vmem:[#allocation2 + $0x670] sm:$0xff]  ;;  %v212_v37 = vld [vmem:[#allocation2 + $0x5b8] sm:$0xff] }
  0x5a   :  { %495 = vmatpush.msra.mxu2 %v74_v38  ;;  %453 = vmatpush.msra.mxu0 %v89_v40  ;;  %v99_v38 = vld [vmem:[#allocation2 + $0x230] sm:$0xff]  ;;  %v76_v40 = vld [vmem:[#allocation2 + $0x178] sm:$0xff] }
  0x5b   :  { %515 = vmatpush.msra.mxu3 %v202_v39  ;;  %473 = vmatpush.msra.mxu1 %v217_v41  ;;  %v227_v39 = vld [vmem:[#allocation2 + $0x630] sm:$0xff]  ;;  %v204_v41 = vld [vmem:[#allocation2 + $0x578] sm:$0xff] }
  0x5c   :  { %496 = vmatpush.msra.mxu2 %v66_v42  ;;  %454 = vmatpush.msra.mxu0 %v81_v44  ;;  %v91_v42 = vld [vmem:[#allocation2 + $0x1f0] sm:$0xff]  ;;  %v68_v44 = vld [vmem:[#allocation2 + $0x138] sm:$0xff] }
  0x5d   :  { %516 = vmatpush.msra.mxu3 %v194_v43  ;;  %474 = vmatpush.msra.mxu1 %v209_v45  ;;  %v219_v43 = vld [vmem:[#allocation2 + $0x5f0] sm:$0xff]  ;;  %v196_v45 = vld [vmem:[#allocation2 + $0x538] sm:$0xff] }
  0x5e   :  { %497 = vmatpush.msra.mxu2 %v58_v46  ;;  %455 = vmatpush.msra.mxu0 %v73_v48  ;;  %v83_v46 = vld [vmem:[#allocation2 + $0x1b0] sm:$0xff]  ;;  %v60_v48 = vld [vmem:[#allocation2 + $0xf8] sm:$0xff] }
  0x5f   :  { %517 = vmatpush.msra.mxu3 %v186_v47  ;;  %475 = vmatpush.msra.mxu1 %v201_v49  ;;  %v211_v47 = vld [vmem:[#allocation2 + $0x5b0] sm:$0xff]  ;;  %v188_v49 = vld [vmem:[#allocation2 + $0x4f8] sm:$0xff] }
  0x60   :  { %498 = vmatpush.msra.mxu2 %v50_v50  ;;  %456 = vmatpush.msra.mxu0 %v65_v52  ;;  %v75_v50 = vld [vmem:[#allocation2 + $0x170] sm:$0xff]  ;;  %v52_v52 = vld [vmem:[#allocation2 + $0xb8] sm:$0xff] }
  0x61   :  { %518 = vmatpush.msra.mxu3 %v178_v51  ;;  %476 = vmatpush.msra.mxu1 %v193_v53  ;;  %v203_v51 = vld [vmem:[#allocation2 + $0x570] sm:$0xff]  ;;  %v180_v53 = vld [vmem:[#allocation2 + $0x4b8] sm:$0xff] }
  0x62   :  { %499 = vmatpush.msra.mxu2 %v42_v54  ;;  %457 = vmatpush.msra.mxu0 %v57_v56  ;;  %v67_v54 = vld [vmem:[#allocation2 + $0x130] sm:$0xff]  ;;  %v44_v56 = vld [vmem:[#allocation2 + $0x78] sm:$0xff] }
  0x63   :  { %519 = vmatpush.msra.mxu3 %v170_v55  ;;  %477 = vmatpush.msra.mxu1 %v185_v57  ;;  %v195_v55 = vld [vmem:[#allocation2 + $0x530] sm:$0xff]  ;;  %v172_v57 = vld [vmem:[#allocation2 + $0x478] sm:$0xff] }
  0x64   :  { %500 = vmatpush.msra.mxu2 %v34_v60  ;;  %441 = vmatmul.f32.vlgmr.msrb.gmra.mxu3 %v676_v59  ;;  %v59_v60 = vld [vmem:[#allocation2 + $0xf0] sm:$0xff] }
  0x65   :  { %520 = vmatpush.msra.mxu3 %v162_v61  ;;  %421 = vmatmul.f32.vlgmr.msrb.gmra.mxu2 %v671_v58  ;;  %v187_v61 = vld [vmem:[#allocation2 + $0x4f0] sm:$0xff] }
  0x66   :  { %565 = vmatpush.msrb.mxu2 %v156_v62  ;;  %458 = vmatpush.msra.mxu0 %v49_v0  ;;  %v36_v62 = vld [vmem:[#allocation2 + $0x38] sm:$0xff]  ;;  %v51_v0 = vld [vmem:[#allocation2 + $0xb0] sm:$0xff] }
  0x67   :  { %585 = vmatpush.msrb.mxu3 %v284_v63  ;;  %478 = vmatpush.msra.mxu1 %v177_v1  ;;  %v164_v63 = vld [vmem:[#allocation2 + $0x438] sm:$0xff]  ;;  %v179_v1 = vld [vmem:[#allocation2 + $0x4b0] sm:$0xff] }
  0x68   :  { %566 = vmatpush.msrb.mxu2 %v148_v2  ;;  %459 = vmatpush.msra.mxu0 %v41_v4  ;;  %v43_v2 = vld [vmem:[#allocation2 + $0x70] sm:$0xff] }
  0x69   :  { %586 = vmatpush.msrb.mxu3 %v276_v3  ;;  %479 = vmatpush.msra.mxu1 %v169_v5  ;;  %v171_v3 = vld [vmem:[#allocation2 + $0x470] sm:$0xff] }
  0x6a   :  { %567 = vmatpush.msrb.mxu2 %v140_v6  ;;  %460 = vmatpush.msra.mxu0 %v33_v8  ;;  %v35_v4 = vld [vmem:[#allocation2 + $0x30] sm:$0xff] }
  0x6b   :  { %587 = vmatpush.msrb.mxu3 %v268_v7  ;;  %480 = vmatpush.msra.mxu1 %v161_v9  ;;  %v163_v5 = vld [vmem:[#allocation2 + $0x430] sm:$0xff] }
  0x6c   :  { %381 = vmatmul.f32.vlgmr.msrb.gmra.mxu0 %v671_v58  ;;  %401 = vmatmul.f32.vlgmr.msrb.gmra.mxu1 %v676_v59 }
  0x6d   :  { %525 = vmatpush.msrb.mxu0 %v155_v10  ;;  %545 = vmatpush.msrb.mxu1 %v283_v11 }
  0x6e   :  { %568 = vmatpush.msrb.mxu2 %v132_v12  ;;  %588 = vmatpush.msrb.mxu3 %v260_v13 }
  0x6f   :  { %526 = vmatpush.msrb.mxu0 %v147_v14  ;;  %546 = vmatpush.msrb.mxu1 %v275_v15 }
  0x70   :  { %569 = vmatpush.msrb.mxu2 %v124_v16  ;;  %589 = vmatpush.msrb.mxu3 %v252_v17 }
  0x71   :  { %527 = vmatpush.msrb.mxu0 %v139_v18  ;;  %547 = vmatpush.msrb.mxu1 %v267_v19 }
  0x72   :  { %570 = vmatpush.msrb.mxu2 %v116_v20  ;;  %590 = vmatpush.msrb.mxu3 %v244_v21 }
  0x73   :  { %528 = vmatpush.msrb.mxu0 %v131_v22  ;;  %548 = vmatpush.msrb.mxu1 %v259_v23 }
  0x74   :  { %571 = vmatpush.msrb.mxu2 %v108_v24  ;;  %591 = vmatpush.msrb.mxu3 %v236_v25 }
  0x75   :  { %529 = vmatpush.msrb.mxu0 %v123_v26  ;;  %549 = vmatpush.msrb.mxu1 %v251_v27 }
  0x76   :  { %572 = vmatpush.msrb.mxu2 %v100_v28  ;;  %592 = vmatpush.msrb.mxu3 %v228_v29 }
  0x77   :  { %530 = vmatpush.msrb.mxu0 %v115_v30  ;;  %550 = vmatpush.msrb.mxu1 %v243_v31 }
  0x78   :  { %573 = vmatpush.msrb.mxu2 %v92_v32  ;;  %593 = vmatpush.msrb.mxu3 %v220_v33 }
  0x79   :  { %531 = vmatpush.msrb.mxu0 %v107_v34  ;;  %551 = vmatpush.msrb.mxu1 %v235_v35 }
  0x7a   :  { %574 = vmatpush.msrb.mxu2 %v84_v36  ;;  %594 = vmatpush.msrb.mxu3 %v212_v37 }
  0x7b   :  { %532 = vmatpush.msrb.mxu0 %v99_v38  ;;  %552 = vmatpush.msrb.mxu1 %v227_v39 }
  0x7c   :  { %575 = vmatpush.msrb.mxu2 %v76_v40  ;;  %595 = vmatpush.msrb.mxu3 %v204_v41 }
  0x7d   :  { %533 = vmatpush.msrb.mxu0 %v91_v42  ;;  %553 = vmatpush.msrb.mxu1 %v219_v43 }
  0x7e   :  { %576 = vmatpush.msrb.mxu2 %v68_v44  ;;  %596 = vmatpush.msrb.mxu3 %v196_v45 }
  0x7f   :  { %501 = vmatmul.f32.vlgmr.msra.gmra.mxu2 %v671_v58  ;;  %521 = vmatmul.f32.vlgmr.msra.gmra.mxu3 %v676_v59 }
  0x80   :  { %534 = vmatpush.msrb.mxu0 %v83_v46  ;;  %554 = vmatpush.msrb.mxu1 %v211_v47 }
  0x81   :  { %577 = vmatpush.msrb.mxu2 %v60_v48  ;;  %597 = vmatpush.msrb.mxu3 %v188_v49 }
  0x82   :  { %535 = vmatpush.msrb.mxu0 %v75_v50  ;;  %555 = vmatpush.msrb.mxu1 %v203_v51 }
  0x83   :  { %578 = vmatpush.msrb.mxu2 %v52_v52  ;;  %598 = vmatpush.msrb.mxu3 %v180_v53 }
  0x84   :  { %536 = vmatpush.msrb.mxu0 %v67_v54  ;;  %556 = vmatpush.msrb.mxu1 %v195_v55 }
  0x85   :  { %579 = vmatpush.msrb.mxu2 %v44_v56  ;;  %599 = vmatpush.msrb.mxu3 %v172_v57 }
  0x86   :  { %461 = vmatmul.f32.vlgmr.msra.gmra.mxu0 %v671_v58  ;;  %481 = vmatmul.f32.vlgmr.msra.gmra.mxu1 %v676_v59 }
  0x87   :  { %537 = vmatpush.msrb.mxu0 %v59_v60  ;;  %557 = vmatpush.msrb.mxu1 %v187_v61 }
  0x88   :  { %580 = vmatpush.msrb.mxu2 %v36_v62  ;;  %600 = vmatpush.msrb.mxu3 %v164_v63 }
  0x89   :  { %581 = vmatmul.f32.vlgmr.msrb.gmra.mxu2 %v671_v58  ;;  %601 = vmatmul.f32.vlgmr.msrb.gmra.mxu3 %v676_v59 }
  0x8a   :  { %538 = vmatpush.msrb.mxu0 %v51_v0  ;;  %558 = vmatpush.msrb.mxu1 %v179_v1 }
  0x8c   :  { %539 = vmatpush.msrb.mxu0 %v43_v2  ;;  %559 = vmatpush.msrb.mxu1 %v171_v3 }
  0x8e   :  { %540 = vmatpush.msrb.mxu0 %v35_v4  ;;  %560 = vmatpush.msrb.mxu1 %v163_v5 }
  0x8f   :  { %541 = vmatmul.f32.vlgmr.msrb.gmra.mxu0 %v671_v58  ;;  %561 = vmatmul.f32.vlgmr.msrb.gmra.mxu1 %v676_v59 }
  0xc3   :  { %v362_v7 = vpop.f32.mrf.mxu3 }
  0xc4   :  { %v342_v6 = vpop.f32.mrf.mxu2 }
  0xc5   :  { %v302_v8 = vpop.f32.mrf.mxu0  ;;  %v363_v10 = vadd.f32 %v362_v7, %v342_v6 }
  0xc6   :  { %v322_v9 = vpop.f32.mrf.mxu1 }
  0xc7   :  { %v323_v11 = vadd.f32 %v322_v9, %v302_v8  ;;  %606 = vst [vmem:[%s720_s2 + $0x8] sm:$0xff] %v363_v10 }
  0xc9   :  { %605 = vst [vmem:[%s720_s2] sm:$0xff] %v323_v11 }
  0xe7   :  { %v442_v13 = vpop.f32.mrf.mxu3 }
  0xe8   :  { %v422_v12 = vpop.f32.mrf.mxu2 }
  0xe9   :  { %v382_v14 = vpop.f32.mrf.mxu0  ;;  %v402_v58 = vpop.f32.mrf.mxu1  ;;  %v443_v15 = vadd.f32 %v442_v13, %v422_v12 }
  0xea   :  { %v403_v59 = vadd.f32 %v402_v58, %v382_v14 }
  0xeb   :  { %608 = vst [vmem:[%s720_s2 + $0x18] sm:$0xff] %v443_v15 }
  0xec   :  { %607 = vst [vmem:[%s720_s2 + $0x10] sm:$0xff] %v403_v59 }
 0x102   :  { %v502_v16 = vpop.f32.mrf.mxu2  ;;  %v522_v17 = vpop.f32.mrf.mxu3 }
 0x103   :  { %v462_v18 = vpop.f32.mrf.mxu0  ;;  %v482_v19 = vpop.f32.mrf.mxu1  ;;  %v523_v20 = vadd.f32 %v522_v17, %v502_v16 }
 0x104   :  { %v483_v21 = vadd.f32 %v482_v19, %v462_v18 }
 0x105   :  { %610 = vst [vmem:[%s720_s2 + $0x28] sm:$0xff] %v523_v20 }
 0x106   :  { %609 = vst [vmem:[%s720_s2 + $0x20] sm:$0xff] %v483_v21 }
 0x10c   :  { %v542_v22 = vpop.f32.mrf.mxu0  ;;  %v562_v23 = vpop.f32.mrf.mxu1 }
 0x10d   :  { %v563_v24 = vadd.f32 %v562_v23, %v542_v22  ;;  %v582_v25 = vpop.f32.mrf.mxu2  ;;  %v602_v26 = vpop.f32.mrf.mxu3 }
 0x10e   :  { %v603_v27 = vadd.f32 %v602_v26, %v582_v25 }
 0x10f   :  { %611 = vst [vmem:[%s720_s2 + $0x30] sm:$0xff] %v563_v24 }
 0x110   :  { %612 = vst [vmem:[%s720_s2 + $0x38] sm:$0xff] %v603_v27 }
 0x111   :  { %617 = vsyncpa [#allocation3], 1 }

</bundles_post_ra>
